<compile_context>
chip_gen: v7x
topology: tpu7x:2x2x1
jax: 0.10.0
libtpu: 0.0.40
codegen_flags: <defaults>
</compile_context>

<pallas_src>
import functools

import jax
import jax.numpy as jnp
from jax.experimental import pallas as pl
from jax.experimental.pallas import tpu as pltpu


def conv_block_kernel(x_ref, w_ref, b_ref, o_ref, relu_ref,
                      *, H, W, Cin, Cout, KH, KW, Kpad):
    # x_ref   : (1, H, W*Cin)        un-padded NHWC slab (lanes = W*Cin)
    # w_ref   : (KH*Kpad, W*Cout)    banded conv-as-matmul weights
    # b_ref   : (1, W*Cout)          bias tiled across W
    # o_ref   : (1, H, W*Cout)       lane-dense output slab
    # relu_ref: (Hp, Kpad) VMEM scratch -> ReLU'd, zero-padded input slab
    ph, pw = KH // 2, KW // 2

    # (1) Build the ReLU'd, zero-padded slab once (ReLU(0) == 0, so padding
    #     before/after the activation is equivalent).
    relu_ref[...] = jnp.zeros_like(relu_ref)
    relu_ref[ph:ph + H, pw * Cin:pw * Cin + W * Cin] = (
        jnp.maximum(x_ref[0], 0.0).astype(relu_ref.dtype))

    # (2) One MXU matmul: concatenate the KH row-shifted slabs along the lane
    #     axis at 128-aligned offsets (kh * Kpad) and contract over K at once.
    patch = jnp.concatenate(
        [relu_ref[kh:kh + H, :] for kh in range(KH)], axis=1)   # (H, KH*Kpad)
    acc = jnp.dot(patch, w_ref[...], preferred_element_type=jnp.float32)

    # (3) Bias + lane-dense store (W*Cout lanes, unmasked for the demo shapes).
    o_ref[0] = (acc + b_ref[...]).astype(o_ref.dtype)


def conv_block_forward(x_nchw, weight_oihw, bias):
    """Pallas implementation of ConvBlock.forward: conv2d(relu(x)), same padding."""
    N, Cin, H, W = x_nchw.shape
    Cout, Cin_w, KH, KW = weight_oihw.shape
    assert Cin == Cin_w
    assert KH % 2 == 1 and KW % 2 == 1, "'same' padding assumes odd kernel sizes"
    ph, pw = KH // 2, KW // 2
    Hp, Wp = H + 2 * ph, W + 2 * pw
    Kpad = ((Wp * Cin + 127) // 128) * 128       # 128-aligned K slot per kh tap row

    # ---- layout glue (one-time parameter prep + NCHW<->NHWC boundary) ------
    x_rows = jnp.transpose(x_nchw, (0, 2, 3, 1)).reshape(N, H, W * Cin)

    # Banded weights: W2[kh*Kpad + wp*Cin + ci, w*Cout + co]
    #                  = W[kh, wp - w, ci, co] if 0 <= wp - w < KW else 0
    w_hwio = jnp.transpose(weight_oihw, (2, 3, 1, 0))            # (KH,KW,Cin,Cout)
    kw_idx = jnp.arange(Wp)[:, None] - jnp.arange(W)[None, :]    # (Wp, W)
    valid = (kw_idx >= 0) & (kw_idx < KW)
    band = w_hwio[:, jnp.clip(kw_idx, 0, KW - 1)]                # (KH,Wp,W,Cin,Cout)
    band = jnp.where(valid[None, :, :, None, None], band, 0.0)
    band = jnp.transpose(band, (0, 1, 3, 2, 4)).reshape(KH, Wp * Cin, W * Cout)
    band = jnp.pad(band, ((0, 0), (0, Kpad - Wp * Cin), (0, 0)))
    w_flat = band.reshape(KH * Kpad, W * Cout).astype(jnp.float32)

    b_row = jnp.tile(bias, W).reshape(1, W * Cout).astype(jnp.float32)

    kernel = functools.partial(
        conv_block_kernel, H=H, W=W, Cin=Cin, Cout=Cout, KH=KH, KW=KW, Kpad=Kpad)

    out = pl.pallas_call(
        kernel,
        out_shape=jax.ShapeDtypeStruct((N, H, W * Cout), x_nchw.dtype),
        grid_spec=pltpu.PrefetchScalarGridSpec(
            num_scalar_prefetch=0,
            grid=(N,),                                       # v7x: 2 TCs split the batch
            in_specs=[
                pl.BlockSpec((1, H, W * Cin), lambda n: (n, 0, 0)),
                pl.BlockSpec((KH * Kpad, W * Cout), lambda n: (0, 0)),
                pl.BlockSpec((1, W * Cout), lambda n: (0, 0)),
            ],
            out_specs=pl.BlockSpec((1, H, W * Cout), lambda n: (n, 0, 0)),
            scratch_shapes=[pltpu.VMEM((Hp, Kpad), jnp.float32)],
        ),
        compiler_params=pltpu.CompilerParams(dimension_semantics=("parallel",)),
    )(x_rows, w_flat, b_row)

    out_nhwc = out.reshape(N, H, W, Cout)
    return jnp.transpose(out_nhwc, (0, 3, 1, 2))                 # NHWC -> NCHW


if __name__ == "__main__":
    # Small shapes consistent with the module: x: [m, c, H, W]
    N, Cin, H, W = 2, 4, 16, 16
    Cout, K = 8, 5

    key = jax.random.PRNGKey(0)
    kx, kw, kb = jax.random.split(key, 3)
    x = jax.random.normal(kx, (N, Cin, H, W), dtype=jnp.float32)
    # Deterministic synthetic parameters (PyTorch Conv2d weight layout: OIHW).
    fan_in = Cin * K * K
    weight = jax.random.normal(kw, (Cout, Cin, K, K), dtype=jnp.float32) / jnp.sqrt(fan_in)
    bias = jax.random.normal(kb, (Cout,), dtype=jnp.float32) * 0.1

    out = conv_block_forward(x, weight, bias)
    out = jax.block_until_ready(out)

    # Pure-JAX reference: conv2d(relu(x)) with "same" padding.
    ref = jax.lax.conv_general_dilated(
        jnp.maximum(x, 0.0),
        weight,
        window_strides=(1, 1),
        padding=[(K // 2, K // 2), (K // 2, K // 2)],
        dimension_numbers=("NCHW", "OIHW", "NCHW"),
    ) + bias.reshape(1, Cout, 1, 1)

    assert out.shape == (N, Cout, H, W)
    assert jnp.allclose(out, ref, atol=2e-4, rtol=1e-4)

    print("KERNEL_OK")
</pallas_src>

<mosaic_0001>
module attributes {stable_mosaic.version = 11 : i64} {
  func.func @conv_block_kernel(%arg0: i32, %arg1: memref<1x16x64xf32, #tpu.memory_space<vmem>>, %arg2: memref<640x128xf32, #tpu.memory_space<vmem>>, %arg3: memref<1x128xf32, #tpu.memory_space<vmem>>, %arg4: memref<1x16x128xf32, #tpu.memory_space<vmem>>, %arg5: memref<20x128xf32, #tpu.memory_space<vmem>>) attributes {dimension_semantics = [#tpu.dimension_semantics<parallel>], iteration_bounds = array<i64: 2>, scalar_prefetch = 0 : i64, scratch_operands = 1 : i64, tpu.core_type = #tpu.core_type<tc>, window_params = [{transform_indices = @transform_0, window_bounds = array<i64: 1, 16, 64>}, {pipeline_mode = #tpu.pipeline_mode<synchronous>, transform_indices = @transform_1, window_bounds = array<i64: 640, 128>}, {pipeline_mode = #tpu.pipeline_mode<synchronous>, transform_indices = @transform_2, window_bounds = array<i64: 1, 128>}, {transform_indices = @transform_3, window_bounds = array<i64: 1, 16, 128>}]} {
    %cst = arith.constant 0.000000e+00 : f32
    %0 = vector.broadcast %cst : f32 to vector<20x128xf32>
    %c0 = arith.constant 0 : index
    %c0_0 = arith.constant 0 : index
    %1 = vector.load %arg5[%c0, %c0_0] : memref<20x128xf32, #tpu.memory_space<vmem>>, vector<20x128xf32>
    tpu.vector_store %arg5[%c0, %c0_0], %0 {strides = array<i32>} : memref<20x128xf32, #tpu.memory_space<vmem>>, vector<20x128xf32>,
    %c0_1 = arith.constant 0 : index
    %c0_2 = arith.constant 0 : index
    %c0_3 = arith.constant 0 : index
    %2 = vector.load %arg1[%c0_1, %c0_2, %c0_3] : memref<1x16x64xf32, #tpu.memory_space<vmem>>, vector<1x16x64xf32>
    %3 = vector.shape_cast %2 : vector<1x16x64xf32> to vector<16x64xf32>
    %cst_4 = arith.constant 0.000000e+00 : f32
    %4 = vector.broadcast %cst_4 : f32 to vector<16x64xf32>
    %5 = arith.maximumf %3, %4 : vector<16x64xf32>
    %c2 = arith.constant 2 : index
    %c8 = arith.constant 8 : index
    %6 = vector.load %arg5[%c2, %c8] : memref<20x128xf32, #tpu.memory_space<vmem>>, vector<16x64xf32>
    tpu.vector_store %arg5[%c2, %c8], %5 {strides = array<i32>} : memref<20x128xf32, #tpu.memory_space<vmem>>, vector<16x64xf32>,
    %c0_5 = arith.constant 0 : index
    %c0_6 = arith.constant 0 : index
    %7 = vector.load %arg5[%c0_5, %c0_6] : memref<20x128xf32, #tpu.memory_space<vmem>>, vector<16x128xf32>
    %c1 = arith.constant 1 : index
    %c0_7 = arith.constant 0 : index
    %8 = vector.load %arg5[%c1, %c0_7] : memref<20x128xf32, #tpu.memory_space<vmem>>, vector<16x128xf32>
    %c2_8 = arith.constant 2 : index
    %c0_9 = arith.constant 0 : index
    %9 = vector.load %arg5[%c2_8, %c0_9] : memref<20x128xf32, #tpu.memory_space<vmem>>, vector<16x128xf32>
    %c3 = arith.constant 3 : index
    %c0_10 = arith.constant 0 : index
    %10 = vector.load %arg5[%c3, %c0_10] : memref<20x128xf32, #tpu.memory_space<vmem>>, vector<16x128xf32>
    %c4 = arith.constant 4 : index
    %c0_11 = arith.constant 0 : index
    %11 = vector.load %arg5[%c4, %c0_11] : memref<20x128xf32, #tpu.memory_space<vmem>>, vector<16x128xf32>
    %12 = tpu.concatenate %7, %8, %9, %10, %11 in 1 : vector<16x128xf32>, vector<16x128xf32>, vector<16x128xf32>, vector<16x128xf32>, vector<16x128xf32> -> vector<16x640xf32>
    %c0_12 = arith.constant 0 : index
    %c0_13 = arith.constant 0 : index
    %13 = vector.load %arg2[%c0_12, %c0_13] : memref<640x128xf32, #tpu.memory_space<vmem>>, vector<640x128xf32>
    %cst_14 = arith.constant dense<0.000000e+00> : vector<16x128xf32>
    %14 = tpu.matmul %12, %13, %cst_14 {dimension_numbers = #tpu.dot_dimension_numbers<[1], [0], [0], [1], [0, 0, 1, 1], [], []>} : vector<16x640xf32>, vector<640x128xf32>, vector<16x128xf32> -> vector<16x128xf32>
    %c0_15 = arith.constant 0 : index
    %c0_16 = arith.constant 0 : index
    %15 = vector.load %arg3[%c0_15, %c0_16] : memref<1x128xf32, #tpu.memory_space<vmem>>, vector<1x128xf32>
    %16 = vector.broadcast %15 : vector<1x128xf32> to vector<16x128xf32>
    %17 = arith.addf %14, %16 : vector<16x128xf32>
    %c0_17 = arith.constant 0 : index
    %c0_18 = arith.constant 0 : index
    %c0_19 = arith.constant 0 : index
    %18 = vector.load %arg4[%c0_17, %c0_18, %c0_19] : memref<1x16x128xf32, #tpu.memory_space<vmem>>, vector<1x16x128xf32>
    %19 = vector.shape_cast %18 : vector<1x16x128xf32> to vector<16x128xf32>
    %20 = vector.shape_cast %17 : vector<16x128xf32> to vector<1x16x128xf32>
    tpu.vector_store %arg4[%c0_17, %c0_18, %c0_19], %20 {strides = array<i32>} : memref<1x16x128xf32, #tpu.memory_space<vmem>>, vector<1x16x128xf32>,
    return
  }
  func.func @transform_0(%arg0: i32) -> (i32, i32, i32) {
    %c0_i32 = arith.constant 0 : i32
    %c0_i32_0 = arith.constant 0 : i32
    %c0_i32_1 = arith.constant 0 : i32
    return %arg0, %c0_i32, %c0_i32_0 : i32, i32, i32
  }
  func.func @transform_1(%arg0: i32) -> (i32, i32) {
    %c0_i32 = arith.constant 0 : i32
    %c0_i32_0 = arith.constant 0 : i32
    %c0_i32_1 = arith.constant 0 : i32
    return %c0_i32, %c0_i32_0 : i32, i32
  }
  func.func @transform_2(%arg0: i32) -> (i32, i32) {
    %c0_i32 = arith.constant 0 : i32
    %c0_i32_0 = arith.constant 0 : i32
    %c0_i32_1 = arith.constant 0 : i32
    return %c0_i32, %c0_i32_0 : i32, i32
  }
  func.func @transform_3(%arg0: i32) -> (i32, i32, i32) {
    %c0_i32 = arith.constant 0 : i32
    %c0_i32_0 = arith.constant 0 : i32
    %c0_i32_1 = arith.constant 0 : i32
    return %arg0, %c0_i32, %c0_i32_0 : i32, i32, i32
  }
}

</mosaic_0001>

<bundles_post_ra>
// kernel: tpu_custom_call.1
= control target key start
LH: loop header
LB: loop body
LE: loop exit
PB: predicated region body
PF: predicated region fallthrough
CT: control target
= control target key end

     0   :  { %8 = vsyncpa [#allocation4], 0  ;;  %s1324_s0 = inlined_call_operand.hbm [shape: f32[2,16,64], index: 0, kind: input, shape index: {}]   ;;  %s1325_s1 = inlined_call_operand.hbm [shape: f32[640,128], index: 1, kind: input, shape index: {}]   ;;  %s1326_s2 = inlined_call_operand.vmem [shape: f32[1,128], index: 2, kind: input, shape index: {}]   ;;  %s1327_s3 = inlined_call_operand.hbm [shape: f32[2,16,128], index: 3, kind: output, shape index: {}]  }
   0x1   :  { %10 = vsyncpa [#allocation4 + $0x1], 0 }
   0x2   :  { %11 = vsyncpa [#allocation7], 0 }
   0x3   :  { %12 = vsyncpa [#allocation5], 0 }
   0x4   :  { %14 = vsyncpa [#allocation5 + $0x1], 0  ;;  %s1107_s12 = smov 0   ;;  %s1109_s13 = smov 0  }
   0x5   :  { %s1111_s14 = smov 0   ;;  %s1113_s15 = smov 0  }
   0x6 LB: > { %s1128_s16 = sadd.s32 4294967295, %s1077_s15   ;;  %s643_s17 = sadd.s32 4294967294, %s1077_s15   ;;  %s1077_s15 = sphi %s1113_s15, %s1347_s15   ;;  %s1073_s14 = sphi %s1111_s14, %s1346_s14   ;;  %s1069_s13 = sphi %s1109_s13, %s1345_s13   ;;  %s1065_s12 = sphi %s1107_s12, %s1344_s12  }
   0x7   : > { %p40_p0 = scmp.ne.s32.totalorder %s1069_s13, %s1065_s12  ;;  %p1328_p1 = scmp.eq.s32.totalorder %s1128_s16, 0 }
   0x8   : > { %p112_p3 = scmp.eq.s32.totalorder %s643_s17, 1  ;;  %p644_p5 = scmp.ge.s32.totalorder %s1077_s15, 1 }
   0x9   : > { %p1137_p4 = por %p1328_p1, %p40_p0  ;;  %p119_p7 = scmp.lt.s32.totalorder %s1077_s15, 3 }
   0xa   : > { %p1142_p6 = por %p112_p3, %p40_p0  ;;  %s1079_s21 = smov [#allocation6]  }
   0xb   : > { %s1331_s18 = scalar_select %p1137_p4, 1, 0 }
   0xc   : > { %s1332_s19 = scalar_select %p1142_p6, 1, 0 }
   0xd   : > { %p1147_p8 = pnand %p644_p5, %p119_p7  ;;  %s131_s22 = sshll.u32 %s1079_s21, 4  ;;  %s1151_s22 = int_to_ptr.vmem [resolvable:$true] %s131_s22 }
   0xe   : > { %s1163_s24 = sadd.s32 1, %s1077_s15   ;;  %s27_s25 = sadd.s32 1, %s1073_s14 }
   0xf   : > { %s1333_s20 = scalar_select %p1147_p8, 1, 0 }
  0x10   : > { %p895_p9 = pneg %p1147_p8  ;;  %s24_s26 = ssub.s32 %s1077_s15, %s1163_s24 }
  0x11   : > { %s949_s29 = scalar_lea.hbm %s1325_s1, 10240 }
  0x12   : > { %p1158_p11 = pnand %p895_p9, %p1328_p1  ;;  %p950_p12 = scmp.ne.s32.totalorder %s1325_s1, %s949_s29 }
  0x13   : > { %p956_p5 = scmp.lt.u32.totalorder %s949_s29, %s1325_s1 }
  0x14   : > { %p951_p13 = pneg %p1158_p11 }
  0x16   : > { %p952_p0 = pnand %p951_p13, %p950_p12 }
  0x18   : > { %p953_p3 = pneg %p952_p0 }
  0x1a   : > { %p958_p7 = pnand %p956_p5, %p953_p3 }
  0x1c   : > { %961 = shalt.err (!%p958_p7)
}
  0x1d   : > { %s962_s7 = scalar_lea.vmem %s1151_s22, 10240  ;;  %p970_p2 = scmp.lt.s32.totalorder %s1151_s22, %s1151_s22 }
  0x1e   : > { %p963_p9 = scmp.ne.s32.totalorder %s1151_s22, %s962_s7  ;;  %p971_p6 = scmp.lt.s32.totalorder %s962_s7, %s962_s7 }
  0x20   : > { %p965_p10 = pnand %p963_p9, %p951_p13  ;;  %p972_p4 = por %p971_p6, %p970_p2 }
  0x22   : > { %p966_p1 = pneg %p965_p10 }
  0x24   : > { %p973_p8 = pnand %p972_p4, %p966_p1 }
  0x26   : > { %976 = shalt.err (!%p973_p8)
}
  0x27   : > { %s1080_s8 = smov 128   ;;  %s1081_s9 = smov 8  }
  0x28   : > { %898 = dma.hbm_to_vmem [thread:$0]  (!%p1158_p11), %s1325_s1, 10240, %s1151_s22, [#allocation7], %s1080_s8, %s1080_s8, %s1081_s9  }
  0x29   : > { %p25_p1 = scmp.eq.s32.totalorder %s24_s26, 0  ;;  %p34_p2 = scmp.ne.s32.totalorder %s1073_s14, %s1069_s13 }
  0x2a   : > { %p35_p4 = scmp.eq.s32.totalorder %s1077_s15, 0  ;;  %p908_p6 = scmp.lt.s32.totalorder %s1077_s15, 2 }
  0x2b   : > { %s1197_s17 = scalar_select %p25_p1, %s1073_s14, %s27_s25  }
  0x2c   : > { %p36_p8 = por %p35_p4, %p34_p2  ;;  %p1335_p10 = scmp.eq.s32.totalorder %s1128_s16, 1 }
  0x2d   : > { %s148_s23 = sand.u32 1, %s1073_s14   ;;  %s660_s27 = sshll.u32 %s1077_s15, 8 }
  0x2e   : > { %p1201_p12 = por %p1335_p10, %p34_p2  ;;  %s647_s28 = sshll.u32 %s148_s23, 4 }
  0x2f   : > { %s1210_s4 = scalar_lea.hbm %s1324_s0, %s660_s27  ;;  %s152_s22 = scalar_lea.vmem [#allocation3], %s647_s28 }
  0x30   : > { %s159_s25 = sshll.u32 %s152_s22, 4  ;;  %p1212_p11 = pnand %p908_p6, %p36_p8  ;;  %s1216_s25 = int_to_ptr.vmem [resolvable:$true] %s159_s25 }
  0x31   : > { %s1218_s5 = scalar_lea.sflag [#allocation4], %s148_s23  ;;  %s977_s6 = scalar_lea.hbm %s1210_s4, 256 }
  0x32   : > { %p978_p13 = scmp.ne.s32.totalorder %s1210_s4, %s977_s6  ;;  %p979_p0 = pneg %p1212_p11 }
  0x33   : > { %s982_s11 = scalar_lea.hbm %s1324_s0, 512  ;;  %p983_p7 = scmp.lt.u32.totalorder %s1210_s4, %s1324_s0 }
  0x34   : > { %p980_p3 = pnand %p979_p0, %p978_p13  ;;  %p984_p9 = scmp.lt.u32.totalorder %s982_s11, %s977_s6 }
  0x35   : > { %p986_p2 = scmp.lt.u32.totalorder %s977_s6, %s1210_s4 }
  0x36   : > { %p981_p5 = pneg %p980_p3  ;;  %p985_p1 = por %p984_p9, %p983_p7 }
  0x38   : > { %p987_p4 = por %p986_p2, %p985_p1 }
  0x3a   : > { %p988_p6 = pnand %p987_p4, %p981_p5 }
  0x3c   : > { %991 = shalt.err (!%p988_p6)
}
  0x3d   : > { %s992_s23 = scalar_lea.vmem %s1216_s25, 256  ;;  %s1082_s29 = smov [#allocation3]  }
  0x3e   : > { %p993_p8 = scmp.ne.s32.totalorder %s1216_s25, %s992_s23  ;;  %s997_s30 = sshll.u32 %s1082_s29, 4  ;;  %s998_s30 = int_to_ptr.vmem [resolvable:$false] %s997_s30 }
  0x3f   : > { %s999_s22 = scalar_lea.vmem %s998_s30, 512  ;;  %p1000_p3 = scmp.lt.s32.totalorder %s1216_s25, %s998_s30 }
  0x40   : > { %p995_p10 = pnand %p993_p8, %p979_p0  ;;  %p1001_p7 = scmp.lt.s32.totalorder %s999_s22, %s992_s23 }
  0x42   : > { %p996_p13 = pneg %p995_p10  ;;  %p1002_p9 = por %p1001_p7, %p1000_p3 }
  0x44   : > { %p1003_p1 = pnand %p1002_p9, %p996_p13 }
  0x46   : > { %1006 = shalt.err (!%p1003_p1)
}
  0x47   : > { %902 = dma.hbm_to_vmem [thread:$0]  (!%p1212_p11), %s1210_s4, 256, %s1216_s25, %s1218_s5, %s1080_s8, %s1080_s8, %s1081_s9  }
  0x48   : > { %p1338_p0 = scmp.ne.s32.totalorder %s1333_s20, 0 }
  0x49   : > { %s1252_s6 = sand.u32 (!%p1338_p0), 1, %s1069_s13   ;;  %p1339_p5 = scmp.ne.s32.totalorder (!%p1338_p0), %s1331_s18, 0 }
  0x4a   : > { %171 = sbr.rel (%p1338_p0) target bundleno = 475 (0x1db), region = 32  ;;  %s651_s7 = sshll.u32 (!%p1338_p0), %s1252_s6, 4 }
  0x4b   : > { %s174_s10 = scalar_lea.sflag (!%p1338_p0), [#allocation4], %s1252_s6  ;;  %s177_s26 = scalar_lea.vmem (!%p1338_p0), [#allocation3], %s651_s7 }
  0x51   : > { %1052 = dma.done.wait (%p1339_p5), %s174_s10, 256  }
  0x52   : > { %1054 = vsyncadd (%p1339_p5), %s174_s10, 4294967040  ;;  %p1340_p11 = scmp.eq.s32.totalorder %s1128_s16, 0 }
  0x54   : > { %1056 = dma.done.wait (%p1340_p11), [#allocation7], 10240   ;;  %p1341_p2 = pmov %p1340_p11 }
  0x55   : > { %v1083_v0 = vmov 0.0   ;;  %v207_v1 = vld [vmem:[%s177_s26] sm:$0xff]  ;;  %v208_v2 = vld [vmem:[%s177_s26 + $0x8] sm:$0xff]  ;;  %s1084_s18 = smov 8   ;;  %vm219_vm0 = vcmask 588864   ;;  %s203_s9 = scalar_lea.vmem [#allocation8], %s651_s7 }
  0x56   : > { %1058 = vsyncadd (%p1341_p2), [#allocation7], 4294957056  ;;  %204 = vst [vmem:[#allocation2] sm:$0xff] %v1083_v0  ;;  %v248_v3 = vld [vmem:[#allocation6 + $0x80] sm:$0xff]  ;;  %v209_v4 = vmax.f32 %v207_v1, 0.0  ;;  %v249_v5 = vld [vmem:[#allocation6 + $0x88] sm:$0xff] }
  0x57   : > { %205 = vst [vmem:[#allocation2 + $0x8] sm:$0xff] %v1083_v0  ;;  %206 = vst [vmem:[#allocation2 + $0x10] sm:$0xf] %v1083_v0  ;;  %v232_v6 = vld [vmem:[#allocation6] sm:$0xff]  ;;  %v233_v7 = vld [vmem:[#allocation6 + $0x8] sm:$0xff]  ;;  %v791_v8 = vpack.c.bf16 %v249_v5, %v248_v3  ;;  %v210_v13 = vmax.f32 %v208_v2, 0.0 }
  0x58   : > { %v793_v9 = vpack.c.bf16 %v233_v7, %v232_v6  ;;  %v250_v10 = vld [vmem:[#allocation6 + $0x90] sm:$0xff]  ;;  %v251_v11 = vld [vmem:[#allocation6 + $0x98] sm:$0xff]  ;;  %213 = vrot.lane.b32.xlu0 %v209_v4, %s1084_s18  ;;  %v280_v16 = vld [vmem:[#allocation6 + $0x180] sm:$0xff]  ;;  %s560_s4 = sshll.u32 %s203_s9, 4  ;;  %s661_s25 = sshll.u32 %s1128_s16, 8  ;;  %s1274_s4 = int_to_ptr.vmem [resolvable:$true] %s560_s4 }
  0x59   : > { %v234_v12 = vld [vmem:[#allocation6 + $0x10] sm:$0xff]  ;;  %v795_v14 = vpack.c.bf16 %v251_v11, %v250_v10  ;;  %v235_v15 = vld [vmem:[#allocation6 + $0x18] sm:$0xff]  ;;  %v281_v17 = vld [vmem:[#allocation6 + $0x188] sm:$0xff]  ;;  %792 = vmatprep.subr.bf16.mxu0 %v791_v8  ;;  %s1279_s27 = scalar_lea.hbm %s1327_s3, %s661_s25  ;;  %s547_s28 = scalar_lea.sflag [#allocation5], %s1252_s6 }
  0x5a   : > { %v823_v18 = vpack.c.bf16 %v281_v17, %v280_v16  ;;  %v264_v19 = vld [vmem:[#allocation6 + $0x100] sm:$0xff]  ;;  %v265_v20 = vld [vmem:[#allocation6 + $0x108] sm:$0xff]  ;;  %794 = vmatpush3.bf16.msra.mxu0 %v793_v9  ;;  %v797_v22 = vpack.c.bf16 %v235_v15, %v234_v12  ;;  %v282_v28 = vld [vmem:[#allocation6 + $0x190] sm:$0xff]  ;;  %s1007_s23 = scalar_lea.vmem %s1274_s4, 256  ;;  %s1085_s16 = smov [#allocation8]  }
  0x5b   : > { %v252_v21 = vld [vmem:[#allocation6 + $0xa0] sm:$0xff]  ;;  %v825_v23 = vpack.c.bf16 %v265_v20, %v264_v19  ;;  %v253_v24 = vld [vmem:[#allocation6 + $0xa8] sm:$0xff]  ;;  %796 = vmatprep.subr.bf16.mxu0 %v795_v14  ;;  %v283_v29 = vld [vmem:[#allocation6 + $0x198] sm:$0xff]  ;;  %p1008_p4 = scmp.ne.s32.totalorder %s1274_s4, %s1007_s23  ;;  %s1011_s29 = sshll.u32 %s1085_s16, 4  ;;  %s1012_s29 = int_to_ptr.vmem [resolvable:$false] %s1011_s29 }
  0x5c   : > { %v236_v25 = vld [vmem:[#allocation6 + $0x20] sm:$0xff]  ;;  %v237_v26 = vld [vmem:[#allocation6 + $0x28] sm:$0xff]  ;;  %824 = vmatprep.subr.bf16.mxu1 %v823_v18  ;;  %v799_v27 = vpack.c.bf16 %v253_v24, %v252_v21  ;;  %v266_v30 = vld [vmem:[#allocation6 + $0x110] sm:$0xff]  ;;  %215 = vrot.lane.b32.xlu0 %v210_v13, %s1084_s18  ;;  %v827_v31 = vpack.c.bf16 %v283_v29, %v282_v28  ;;  %s1013_s30 = scalar_lea.vmem %s1012_s29, 512  ;;  %p1014_p10 = scmp.lt.s32.totalorder %s1274_s4, %s1012_s29 }
  0x5d   : > { %826 = vmatpush3.bf16.msra.mxu1 %v825_v23  ;;  %v267_v32 = vld [vmem:[#allocation6 + $0x118] sm:$0xff]  ;;  %v254_v33 = vld [vmem:[#allocation6 + $0xb0] sm:$0xff]  ;;  %v284_v36 = vld [vmem:[#allocation6 + $0x1a0] sm:$0xff]  ;;  %v801_v37 = vpack.c.bf16 %v237_v26, %v236_v25  ;;  %p1009_p6 = pnand %p1008_p4, %p1201_p12  ;;  %p1015_p13 = scmp.lt.s32.totalorder %s1013_s30, %s1007_s23 }
  0x5e   : > { %v255_v34 = vld [vmem:[#allocation6 + $0xb8] sm:$0xff]  ;;  %v829_v35 = vpack.c.bf16 %v267_v32, %v266_v30  ;;  %798 = vmatpush3.bf16.msra.mxu0 %v797_v22  ;;  %828 = vmatprep.subr.bf16.mxu1 %v827_v31  ;;  %v285_v38 = vld [vmem:[#allocation6 + $0x1a8] sm:$0xff]  ;;  %v268_v39 = vld [vmem:[#allocation6 + $0x120] sm:$0xff] }
  0x5f   : > { %v269_v40 = vld [vmem:[#allocation6 + $0x128] sm:$0xff]  ;;  %800 = vmatprep.subr.bf16.mxu0 %v799_v27  ;;  %v803_v41 = vpack.c.bf16 %v255_v34, %v254_v33  ;;  %v238_v42 = vld [vmem:[#allocation6 + $0x30] sm:$0xff]  ;;  %v239_v43 = vld [vmem:[#allocation6 + $0x38] sm:$0xff]  ;;  %v831_v44 = vpack.c.bf16 %v285_v38, %v284_v36  ;;  %p1010_p8 = pneg %p1009_p6  ;;  %p1016_p3 = por %p1015_p13, %p1014_p10 }
  0x60   : > { %v256_v45 = vld [vmem:[#allocation6 + $0xc0] sm:$0xff]  ;;  %v833_v46 = vpack.c.bf16 %v269_v40, %v268_v39  ;;  %v257_v47 = vld [vmem:[#allocation6 + $0xc8] sm:$0xff]  ;;  %v286_v48 = vld [vmem:[#allocation6 + $0x1b0] sm:$0xff]  ;;  %v805_v53 = vpack.c.bf16 %v239_v43, %v238_v42 }
  0x61   : > { %830 = vmatpush3.bf16.msra.mxu1 %v829_v35  ;;  %v287_v49 = vld [vmem:[#allocation6 + $0x1b8] sm:$0xff]  ;;  %v270_v51 = vld [vmem:[#allocation6 + $0x130] sm:$0xff]  ;;  %v240_v54 = vld [vmem:[#allocation6 + $0x40] sm:$0xff]  ;;  %v807_v55 = vpack.c.bf16 %v257_v47, %v256_v45  ;;  %p1017_p7 = pnand %p1016_p3, %p1010_p8 }
  0x62   : > { %832 = vmatprep.subr.bf16.mxu1 %v831_v44  ;;  %v835_v50 = vpack.c.bf16 %v287_v49, %v286_v48  ;;  %v271_v52 = vld [vmem:[#allocation6 + $0x138] sm:$0xff]  ;;  %802 = vmatpush3.bf16.msra.mxu0 %v801_v37  ;;  %v241_v56 = vld [vmem:[#allocation6 + $0x48] sm:$0xff]  ;;  %v288_v57 = vld [vmem:[#allocation6 + $0x1c0] sm:$0xff] }
  0x63   : > { %804 = vmatprep.subr.bf16.mxu0 %v803_v41  ;;  %v289_v58 = vld [vmem:[#allocation6 + $0x1c8] sm:$0xff]  ;;  %v837_v59 = vpack.c.bf16 %v271_v52, %v270_v51  ;;  %v258_v60 = vld [vmem:[#allocation6 + $0xd0] sm:$0xff]  ;;  %v259_v61 = vld [vmem:[#allocation6 + $0xd8] sm:$0xff]  ;;  %v809_v1 = vpack.c.bf16 %v241_v56, %v240_v54 }
  0x64   : > { %v839_v62 = vpack.c.bf16 %v289_v58, %v288_v57  ;;  %v272_v63 = vld [vmem:[#allocation6 + $0x140] sm:$0xff]  ;;  %v273_v0 = vld [vmem:[#allocation6 + $0x148] sm:$0xff]  ;;  %v290_v2 = vld [vmem:[#allocation6 + $0x1d0] sm:$0xff]  ;;  %v811_v4 = vpack.c.bf16 %v259_v61, %v258_v60 }
  0x65   : > { %834 = vmatpush3.bf16.msra.mxu1 %v833_v46  ;;  %v291_v3 = vld [vmem:[#allocation6 + $0x1d8] sm:$0xff]  ;;  %v242_v5 = vld [vmem:[#allocation6 + $0x50] sm:$0xff]  ;;  %v841_v7 = vpack.c.bf16 %v273_v0, %v272_v63  ;;  %v260_v8 = vld [vmem:[#allocation6 + $0xe0] sm:$0xff] }
  0x66   : > { %836 = vmatprep.subr.bf16.mxu1 %v835_v50  ;;  %806 = vmatpush3.bf16.msra.mxu0 %v805_v53  ;;  %v243_v6 = vld [vmem:[#allocation6 + $0x58] sm:$0xff]  ;;  %v261_v9 = vld [vmem:[#allocation6 + $0xe8] sm:$0xff]  ;;  %v843_v10 = vpack.c.bf16 %v291_v3, %v290_v2  ;;  %v274_v11 = vld [vmem:[#allocation6 + $0x150] sm:$0xff] }
  0x67   : > { %808 = vmatprep.subr.bf16.mxu0 %v807_v55  ;;  %v275_v12 = vld [vmem:[#allocation6 + $0x158] sm:$0xff]  ;;  %v813_v13 = vpack.c.bf16 %v243_v6, %v242_v5  ;;  %v292_v14 = vld [vmem:[#allocation6 + $0x1e0] sm:$0xff]  ;;  %v293_v15 = vld [vmem:[#allocation6 + $0x1e8] sm:$0xff]  ;;  %v815_v16 = vpack.c.bf16 %v261_v9, %v260_v8 }
  0x68   : > { %v244_v17 = vld [vmem:[#allocation6 + $0x60] sm:$0xff]  ;;  %v245_v18 = vld [vmem:[#allocation6 + $0x68] sm:$0xff]  ;;  %v845_v19 = vpack.c.bf16 %v275_v12, %v274_v11  ;;  %v262_v20 = vld [vmem:[#allocation6 + $0xf0] sm:$0xff]  ;;  %v847_v22 = vpack.c.bf16 %v293_v15, %v292_v14 }
  0x69   : > { %838 = vmatpush3.bf16.msra.mxu1 %v837_v59  ;;  %v263_v21 = vld [vmem:[#allocation6 + $0xf8] sm:$0xff]  ;;  %v276_v23 = vld [vmem:[#allocation6 + $0x160] sm:$0xff]  ;;  %v277_v24 = vld [vmem:[#allocation6 + $0x168] sm:$0xff]  ;;  %v817_v25 = vpack.c.bf16 %v245_v18, %v244_v17 }
  0x6a   : > { %840 = vmatprep.subr.bf16.mxu1 %v839_v62  ;;  %810 = vmatpush3.bf16.msra.mxu0 %v809_v1  ;;  %v294_v26 = vld [vmem:[#allocation6 + $0x1f0] sm:$0xff]  ;;  %v295_v27 = vld [vmem:[#allocation6 + $0x1f8] sm:$0xff]  ;;  %v819_v28 = vpack.c.bf16 %v263_v21, %v262_v20  ;;  %v849_v31 = vpack.c.bf16 %v277_v24, %v276_v23  ;;  %v296_v32 = vld [vmem:[#allocation6 + $0x200] sm:$0xff] }
  0x6b   : > { %812 = vmatprep.subr.bf16.mxu0 %v811_v4  ;;  %v246_v29 = vld [vmem:[#allocation6 + $0x70] sm:$0xff]  ;;  %v247_v30 = vld [vmem:[#allocation6 + $0x78] sm:$0xff]  ;;  %v297_v33 = vld [vmem:[#allocation6 + $0x208] sm:$0xff]  ;;  %v851_v34 = vpack.c.bf16 %v295_v27, %v294_v26 }
  0x6c   : > { %v278_v35 = vld [vmem:[#allocation6 + $0x170] sm:$0xff]  ;;  %v279_v36 = vld [vmem:[#allocation6 + $0x178] sm:$0xff]  ;;  %v821_v37 = vpack.c.bf16 %v247_v30, %v246_v29  ;;  %v855_v38 = vpack.c.bf16 %v297_v33, %v296_v32  ;;  %v300_v47 = vld [vmem:[#allocation6 + $0x220] sm:$0xff] }
  0x6d   : > { %842 = vmatpush3.bf16.msra.mxu1 %v841_v7  ;;  %v853_v39 = vpack.c.bf16 %v279_v36, %v278_v35  ;;  %v298_v42 = vld [vmem:[#allocation6 + $0x210] sm:$0xff]  ;;  %v299_v43 = vld [vmem:[#allocation6 + $0x218] sm:$0xff]  ;;  %v301_v48 = vld [vmem:[#allocation6 + $0x228] sm:$0xff] }
  0x6e   : > { %844 = vmatprep.subr.bf16.mxu1 %v843_v10  ;;  %814 = vmatpush3.bf16.msra.mxu0 %v813_v13  ;;  %v859_v46 = vpack.c.bf16 %v299_v43, %v298_v42  ;;  %v302_v49 = vld [vmem:[#allocation6 + $0x230] sm:$0xff]  ;;  %v863_v53 = vpack.c.bf16 %v301_v48, %v300_v47  ;;  %v303_v56 = vld [vmem:[#allocation6 + $0x238] sm:$0xff]  ;;  %v304_v60 = vld [vmem:[#allocation6 + $0x240] sm:$0xff] }
  0x6f   : > { %816 = vmatprep.subr.bf16.mxu0 %v815_v16  ;;  %v867_v59 = vpack.c.bf16 %v303_v56, %v302_v49  ;;  %v305_v61 = vld [vmem:[#allocation6 + $0x248] sm:$0xff]  ;;  %v306_v63 = vld [vmem:[#allocation6 + $0x250] sm:$0xff]  ;;  %v307_v0 = vld [vmem:[#allocation6 + $0x258] sm:$0xff] }
  0x70   : > { %v871_v62 = vpack.c.bf16 %v305_v61, %v304_v60  ;;  %v875_v1 = vpack.c.bf16 %v307_v0, %v306_v63  ;;  %v308_v2 = vld [vmem:[#allocation6 + $0x260] sm:$0xff]  ;;  %v309_v3 = vld [vmem:[#allocation6 + $0x268] sm:$0xff]  ;;  %v310_v5 = vld [vmem:[#allocation6 + $0x270] sm:$0xff] }
  0x71   : > { %846 = vmatpush3.bf16.msra.mxu1 %v845_v19  ;;  %v879_v4 = vpack.c.bf16 %v309_v3, %v308_v2  ;;  %v311_v6 = vld [vmem:[#allocation6 + $0x278] sm:$0xff]  ;;  %v654_v12 = vld [vmem:[%s1326_s2] ss:$0 sm:$0xff] }
  0x72   : > { %848 = vmatprep.subr.bf16.mxu1 %v847_v22  ;;  %818 = vmatpush3.bf16.msra.mxu0 %v817_v25  ;;  %v883_v7 = vpack.c.bf16 %v311_v6, %v310_v5 }
  0x73   : > { %820 = vmatprep.subr.bf16.mxu0 %v819_v28 }
  0x75   : > { %850 = vmatpush3.bf16.msra.mxu1 %v849_v31 }
  0x76   : > { %852 = vmatprep.subr.bf16.mxu1 %v851_v34  ;;  %822 = vmatpush3.bf16.msra.mxu0 %v821_v37 }
  0x77   : > { %856 = vmatprep.subr.bf16.mxu0 %v855_v38 }
  0x79   : > { %854 = vmatpush3.bf16.msra.mxu1 %v853_v39 }
  0xca   : > { %v214_v40 = vpop.permute.xlu0 %213 }
  0xcb   : > { %220 = vst.msk [vmem:[#allocation2 + $0x2] sm:$0xff] %vm219_vm0, %v214_v40 }
  0xce   : > { %v216_v41 = vpop.permute.xlu0 %215 }
  0xcf   : > { %221 = vst.msk [vmem:[#allocation2 + $0xa] sm:$0xff] %vm219_vm0, %v216_v41 }
  0xd2   : > { %v224_v44 = vld [vmem:[#allocation2 + $0x1] sm:$0xff] }
  0xd3   : > { %v222_v45 = vld [vmem:[#allocation2] sm:$0xff]  ;;  %383 = vmatprep.mubr.f32.mxu0 %v224_v44 }
  0xd4   : > { %384 = vmatmul.mubr.f32.vlgmr.msra.gmra.mrb[0].mxu0 %v222_v45  ;;  %v226_v54 = vld [vmem:[#allocation2 + $0x2] sm:$0xff] }
  0xd5   : > { %858 = vmatpush3.bf16.msra.mxu0 %v855_v38 }
  0xd6   : > { %v225_v50 = vld [vmem:[#allocation2 + $0x9] sm:$0xff]  ;;  %860 = vmatprep.subr.bf16.mxu0 %v859_v46 }
  0xd7   : > { %v228_v51 = vld [vmem:[#allocation2 + $0x3] sm:$0xff]  ;;  %388 = vmatprep.mubr.f32.mxu0 %v225_v50  ;;  %v229_v55 = vld [vmem:[#allocation2 + $0xb] sm:$0xff] }
  0xd8   : > { %v223_v52 = vld [vmem:[#allocation2 + $0x8] sm:$0xff]  ;;  %458 = vmatprep.mubr.f32.mxu1 %v228_v51 }
  0xd9   : > { %389 = vmatmul.mubr.f32.gmra.mrb[2].mxu0 %v223_v52  ;;  %459 = vmatmul.mubr.f32.vlgmr.msra.gmra.mrb[0].mxu1 %v226_v54  ;;  %v230_v57 = vld [vmem:[#allocation2 + $0x4] sm:$0xff]  ;;  %v231_v8 = vld [vmem:[#allocation2 + $0xc] sm:$0xff] }
  0xda   : > { %862 = vmatpush3.bf16.msra.mxu0 %v859_v46  ;;  %788 = vmatprep.mubr.f32.mxu0 %v230_v57  ;;  %v227_v58 = vld [vmem:[#allocation2 + $0xa] sm:$0xff] }
  0xdb   : > { %463 = vmatprep.mubr.f32.mxu1 %v229_v55  ;;  %864 = vmatprep.subr.bf16.mxu0 %v863_v53 }
  0xdd   : > { %464 = vmatmul.mubr.f32.gmra.mrb[2].mxu1 %v227_v58 }
  0xde   : > { %866 = vmatpush3.bf16.msra.mxu0 %v863_v53 }
  0xdf   : > { %868 = vmatprep.subr.bf16.mxu0 %v867_v59 }
  0xe2   : > { %870 = vmatpush3.bf16.msra.mxu0 %v867_v59 }
  0xe3   : > { %872 = vmatprep.subr.bf16.mxu0 %v871_v62 }
  0xe6   : > { %874 = vmatpush3.bf16.msra.mxu0 %v871_v62 }
  0xe7   : > { %876 = vmatprep.subr.bf16.mxu0 %v875_v1 }
  0xea   : > { %878 = vmatpush3.bf16.msra.mxu0 %v875_v1 }
  0xeb   : > { %880 = vmatprep.subr.bf16.mxu0 %v879_v4 }
  0xee   : > { %882 = vmatpush3.bf16.msra.mxu0 %v879_v4 }
  0xef   : > { %884 = vmatprep.subr.bf16.mxu0 %v883_v7 }
  0xf2   : > { %886 = vmatpush3.bf16.msra.mxu0 %v883_v7 }
  0xf5   : > { %789 = vmatmul.mubr.f32.vlgmr.msra.gmra.mrb[4].mxu0 %v231_v8 }
 0x1a7   : > { %v694_v9 = vpop.f32.mrb[0].mxu0 }
 0x1a8   : > { %v695_v10 = vpop.f32.mrb[1].mxu0 }
 0x1a9   : > { %v696_v11 = vadd.f32 %v695_v10, %v694_v9 }
 0x1ab   : > { %v386_v17 = vadd.f32 %v696_v11, %v654_v12 }
 0x1ac   : > { %v697_v13 = vpop.f32.mrb[2].mxu0  ;;  %v732_v14 = vpop.f32.mrb[0].mxu1 }
 0x1ad   : > { %v698_v15 = vpop.f32.mrb[3].mxu0  ;;  %v733_v16 = vpop.f32.mrb[1].mxu1 }
 0x1ae   : > { %v699_v18 = vadd.f32 %v698_v15, %v697_v13  ;;  %v734_v19 = vadd.f32 %v733_v16, %v732_v14 }
 0x1b0   : > { %v735_v20 = vpop.f32.mrb[2].mxu1  ;;  %v461_v21 = vadd.f32 %v734_v19, %v386_v17  ;;  %v391_v23 = vadd.f32 %v699_v18, %v654_v12 }
 0x1b1   : > { %v736_v22 = vpop.f32.mrb[3].mxu1 }
 0x1b2   : > { %v737_v24 = vadd.f32 %v736_v22, %v735_v20 }
 0x1b4   : > { %v466_v25 = vadd.f32 %v737_v24, %v391_v23 }
 0x1c8   : > { %v790_v26 = vpop.f32.mrb[4].mxu0 }
 0x1c9   : > { %v541_v27 = vadd.f32 %v790_v26, %v466_v25  ;;  %v535_v28 = vpop.f32.mrb[5].mxu0 }
 0x1ca   : > { %v536_v29 = vadd.f32 %v535_v28, %v461_v21 }
 0x1cb   : > { %545 = vst [vmem:[%s203_s9 + $0x8] sm:$0xff] %v541_v27 }
 0x1cc   : > { %544 = vst [vmem:[%s203_s9] sm:$0xff] %v536_v29 }
 0x1cd   : > { %1020 = shalt.err (!%p1017_p7)
}
 0x1ce   : > { %s1021_s22 = scalar_lea.hbm %s1279_s27, 256  ;;  %s1025_s26 = scalar_lea.hbm %s1327_s3, 512 }
 0x1cf   : > { %p1022_p9 = scmp.ne.s32.totalorder %s1279_s27, %s1021_s22  ;;  %p1026_p5 = scmp.lt.u32.totalorder %s1279_s27, %s1327_s3 }
 0x1d0   : > { %p1027_p11 = scmp.lt.u32.totalorder %s1025_s26, %s1021_s22  ;;  %p1029_p4 = scmp.lt.u32.totalorder %s1021_s22, %s1279_s27 }
 0x1d1   : > { %p1023_p1 = pnand %p1022_p9, %p1201_p12 }
 0x1d2   : > { %p1028_p2 = por %p1027_p11, %p1026_p5 }
 0x1d3   : > { %p1024_p0 = pneg %p1023_p1 }
 0x1d4   : > { %p1030_p6 = por %p1029_p4, %p1028_p2 }
 0x1d6   : > { %p1031_p8 = pnand %p1030_p6, %p1024_p0 }
 0x1d8   : > { %1034 = shalt.err (!%p1031_p8)
}
 0x1d9   : > { %s1086_s9 = smov 128  }
 0x1da   : > { %893 = dma.vmem_to_hbm [thread:$0]  (%p1201_p12), %s1274_s4, 256, %s1279_s27, %s547_s28, %s1086_s9, %s1086_s9, %s1084_s18  }
 0x1db PF: > { %s575_s25 = sand.u32 1, %s1065_s12   ;;  %p1342_p10 = scmp.ne.s32.totalorder %s1332_s19, 0 }
 0x1dc   : > { %p1343_p13 = scmp.ge.s32.totalorder %s1077_s15, 2  ;;  %s576_s5 = scalar_lea.sflag [#allocation5], %s575_s25 }
 0x1de   : > { %p904_p3 = pnand %p1343_p13, %p1342_p10 }
 0x1e0   : > { %1060 = dma.done.wait (!%p904_p3), %s576_s5, 256  }
 0x1e1   : > { %1062 = vsyncadd (!%p904_p3), %s576_s5, 4294967040  ;;  %p17_p7 = scmp.ge.s32.totalorder %s1163_s24, 4   ;;  %s1344_s12 = smov %s1069_s13 }
 0x1e2   : > { %s1345_s13 = smov %s1073_s14  ;;  %s1346_s14 = smov %s1197_s17 }
 0x1e3   : > { %s1347_s15 = smov %s1163_s24  ;;  %19 = sbr.rel (!%p17_p7) target bundleno = 6 (0x6), region = 81 }
 0x1ea   :  { %581 = vsyncpa [#allocation4], 1 }
 0x1eb   :  { %583 = vsyncpa [#allocation4 + $0x1], 1 }
 0x1ec   :  { %584 = vsyncpa [#allocation7], 1 }
 0x1ed   :  { %585 = vsyncpa [#allocation5], 1 }
 0x1ee   :  { %587 = vsyncpa [#allocation5 + $0x1], 1 }

</bundles_post_ra>
